<compile_context>
chip_gen: v7x
topology: tpu7x:2x2x1
jax: 0.10.0
libtpu: 0.0.40
codegen_flags: <defaults>
</compile_context>

<pallas_src>
import functools

import numpy as np

import jax
import jax.numpy as jnp
from jax.experimental import pallas as pl
from jax.experimental.pallas import tpu as pltpu


def _largest_divisor_at_most(n, cap):
    cap = max(1, min(n, cap))
    for b in range(cap, 0, -1):
        if n % b == 0:
            return b
    return 1


# --------------------------------------------------------------------------
# Kernel 1: fused ReLU + implicit-GEMM conv (single K=kh*kw*C_in dot per image)
#           + per-block BN partial statistics.
#   x_ref    : (B, C_in, L_flat)   bf16   zero-padded, channel-major, flat spatial
#   w_ref    : (C_out, K)          bf16   K = kh*kw*C_in (tap-major, channel-minor)
#   mask_ref : (1, M_full)         f32    1.0 on columns that are real conv outputs
#   y_ref    : (B, C_out, M_full)  bf16   stride-1 conv outputs at every padded base
#   s1_ref   : (1, C_out, 1)       f32    per-block sum   over valid outputs
#   s2_ref   : (1, C_out, 1)       f32    per-block sum^2 over valid outputs
#   patch_ref: (B, K, M_full)      bf16   VMEM scratch (the patch matrix)
# --------------------------------------------------------------------------
def _relu_conv_stats_kernel(x_ref, w_ref, mask_ref, y_ref, s1_ref, s2_ref,
                            patch_ref, *, kh, kw, c_in, wp, m_full):
    b_blk = x_ref.shape[0]
    c_out = w_ref.shape[0]

    # Build the patch matrix with plain offset loads + sublane stores.  ReLU is
    # fused here (ReLU(0) = 0, so it commutes with the wrapper's zero padding).
    for t in range(kh * kw):
        i, j = divmod(t, kw)
        d = i * wp + j
        patch_ref[:, t * c_in:(t + 1) * c_in, :] = jnp.maximum(
            x_ref[:, :, pl.ds(d, m_full)], 0)

    w = w_ref[...]                       # (C_out, K) bf16, hoisted out of the loop
    mask = mask_ref[...]                 # (1, M_full) f32

    s1 = jnp.zeros((c_out, 1), jnp.float32)
    s2 = jnp.zeros((c_out, 1), jnp.float32)
    for b in range(b_blk):               # small static unrolled loop (B <= 8)
        # One dot per image: (C_out, K) x (K, M_full) -> (C_out, M_full).
        # Result is produced channel-major (lane dim = M_full), f32 accumulation.
        acc = jnp.dot(w, patch_ref[b], preferred_element_type=jnp.float32)
        y_bf = acc.astype(y_ref.dtype)
        y_ref[b] = y_bf
        # Stats from the stored (bf16-rounded) values -> consistent with kernel 2.
        yf = y_bf.astype(jnp.float32)
        ym = yf * mask                   # zero out seam / stride-skipped columns
        s1 = s1 + jnp.sum(ym, axis=1, keepdims=True)
        s2 = s2 + jnp.sum(ym * yf, axis=1, keepdims=True)
    s1_ref[0] = s1
    s2_ref[0] = s2


# --------------------------------------------------------------------------
# Kernel 2: BatchNorm apply as a single FMA on a few large lane-dense blocks.
#   y_ref    : (B2, C_out, M_im) bf16
#   scale_ref: (C_out, 1) f32   (channel-major broadcast along the lane dim)
#   shift_ref: (C_out, 1) f32
#   o_ref    : (B2, C_out, M_im) f32
# --------------------------------------------------------------------------
def _bn_apply_kernel(y_ref, scale_ref, shift_ref, o_ref):
    o_ref[...] = y_ref[...].astype(jnp.float32) * scale_ref[...] + shift_ref[...]


# --------------------------------------------------------------------------
# Wrapper
# --------------------------------------------------------------------------
@functools.partial(jax.jit, static_argnames=("stride", "padding", "eps"))
def relu_conv_bn(x, conv_w, gamma, beta, *, stride, padding, eps=1e-5):
    """x: (N, C_in, H, W) NCHW; conv_w: (C_out, C_in, kh, kw) OIHW. Returns NCHW f32."""
    n, c_in, h, w = x.shape
    c_out, _, kh, kw = conv_w.shape
    hp, wp = h + 2 * padding, w + 2 * padding
    h_out = (hp - kh) // stride + 1
    w_out = (wp - kw) // stride + 1
    m_im = h_out * w_out
    m_total = n * m_im
    k_dim = kh * kw * c_in
    h_rows = hp - kh + 1                  # base rows covered by the stride-1 flat GEMM
    m_full = h_rows * wp                  # GEMM columns per image (incl. seam columns)
    # Tap offsets reach (kh-1)*wp + (kw-1) past the last base column; pad the flat
    # axis so every tap slice stays in bounds (rounded to a 128-lane multiple).
    l_flat = (hp * wp + (kw - 1) + 127) // 128 * 128

    # ---- wrapper-side layout prep (one cheap fused XLA pass over the input) ----
    xp = jnp.pad(x.astype(jnp.bfloat16),
                 ((0, 0), (0, 0), (padding, padding), (padding, padding)))
    xp = xp.reshape(n, c_in, hp * wp)
    xp = jnp.pad(xp, ((0, 0), (0, 0), (0, l_flat - hp * wp)))      # (N, C_in, L_flat)

    # OIHW -> (C_out, kh*kw*C_in), tap-major / channel-minor (matches patch rows).
    w2 = jnp.transpose(conv_w, (0, 2, 3, 1)).reshape(c_out, k_dim).astype(jnp.bfloat16)

    # Validity mask over the m_full GEMM columns (trace-time constant).
    p = np.arange(m_full)
    r, c = p // wp, p % wp
    valid = ((r % stride == 0) & (r // stride < h_out) &
             (c % stride == 0) & (c // stride < w_out))
    mask = jnp.asarray(valid.astype(np.float32).reshape(1, m_full))

    # ---- batch-block size: amortize per-step overhead, stay inside VMEM --------
    # Budget sized for v7x (64 MiB VMEM / 32 MiB scoped default); conservative on
    # v5e/v6e (128 MiB).
    per_img = (2 * c_in * l_flat * 2          # double-buffered input block
               + 2 * c_out * m_full * 2       # double-buffered output block
               + k_dim * m_full * 2)          # patch scratch
    b_blk = _largest_divisor_at_most(n, 8)
    while b_blk > 1 and b_blk * per_img > (24 << 20):
        b_blk = _largest_divisor_at_most(n, b_blk - 1)

    kernel1 = functools.partial(_relu_conv_stats_kernel,
                                kh=kh, kw=kw, c_in=c_in, wp=wp, m_full=m_full)

    y_full, s1, s2 = pl.pallas_call(
        kernel1,
        out_shape=(
            jax.ShapeDtypeStruct((n, c_out, m_full), jnp.bfloat16),
            jax.ShapeDtypeStruct((n // b_blk, c_out, 1), jnp.float32),
            jax.ShapeDtypeStruct((n // b_blk, c_out, 1), jnp.float32),
        ),
        grid_spec=pltpu.PrefetchScalarGridSpec(
            num_scalar_prefetch=0,
            grid=(n // b_blk,),
            in_specs=[
                pl.BlockSpec((b_blk, c_in, l_flat), lambda i: (i, 0, 0)),
                # Grid-invariant weights (sub-KB here; for large weights use
                # pipeline_mode=pl.Buffered(1) to halve their VMEM footprint).
                pl.BlockSpec((c_out, k_dim), lambda i: (0, 0)),
                pl.BlockSpec((1, m_full), lambda i: (0, 0)),
            ],
            out_specs=[
                pl.BlockSpec((b_blk, c_out, m_full), lambda i: (i, 0, 0)),
                pl.BlockSpec((1, c_out, 1), lambda i: (i, 0, 0)),
                pl.BlockSpec((1, c_out, 1), lambda i: (i, 0, 0)),
            ],
            scratch_shapes=[pltpu.VMEM((b_blk, k_dim, m_full), jnp.bfloat16)],
        ),
        compiler_params=pltpu.CompilerParams(
            dimension_semantics=("parallel",),    # per-block partial stats -> safe
            vmem_limit_bytes=32 * 1024 * 1024),
    )(xp, w2, mask)

    # ---- select the valid conv outputs (tiny strided slice on bf16 data) -------
    y_valid = y_full.reshape(n, c_out, h_rows, wp)[:, :, ::stride, ::stride]
    y_valid = y_valid[:, :, :h_out, :w_out].reshape(n, c_out, m_im)

    # ---- BN batch stats -> per-channel scale/shift (tiny XLA reduction) --------
    sum1 = jnp.sum(s1, axis=(0, 2))
    sum2 = jnp.sum(s2, axis=(0, 2))
    mean = sum1 / m_total
    # TODO(synk): E[y^2]-E[y]^2 in f32; switch to a centered second pass for very
    # large m_total if cancellation ever becomes an issue.
    var = jnp.maximum(sum2 / m_total - mean * mean, 0.0)      # biased var (train mode)
    scale = gamma.astype(jnp.float32) * jax.lax.rsqrt(var + eps)
    shift = beta.astype(jnp.float32) - mean * scale
    scale2 = scale.reshape(c_out, 1)
    shift2 = shift.reshape(c_out, 1)

    # ---- kernel 2: y*scale + shift on a few large lane-dense blocks ------------
    per_img2 = 2 * (c_out * m_im * 2 + c_out * m_im * 4)
    b2 = _largest_divisor_at_most(n, max(1, (24 << 20) // max(per_img2, 1)))
    out = pl.pallas_call(
        _bn_apply_kernel,
        out_shape=jax.ShapeDtypeStruct((n, c_out, m_im), jnp.float32),
        grid_spec=pltpu.PrefetchScalarGridSpec(
            num_scalar_prefetch=0,
            grid=(n // b2,),
            in_specs=[
                pl.BlockSpec((b2, c_out, m_im), lambda i: (i, 0, 0)),
                pl.BlockSpec((c_out, 1), lambda i: (0, 0)),
                pl.BlockSpec((c_out, 1), lambda i: (0, 0)),
            ],
            out_specs=pl.BlockSpec((b2, c_out, m_im), lambda i: (i, 0, 0)),
        ),
        compiler_params=pltpu.CompilerParams(
            dimension_semantics=("parallel",),
            vmem_limit_bytes=32 * 1024 * 1024),
    )(y_valid, scale2, shift2)

    # (N, C_out, H_out*W_out) -> (N, C_out, H_out, W_out): metadata-only reshape.
    return out.reshape(n, c_out, h_out, w_out)


# --------------------------------------------------------------------------
# Pure-JAX reference (for sanity check)
# --------------------------------------------------------------------------
def _ref_forward(x, conv_w, gamma, beta, *, stride, padding, eps=1e-5):
    xr = jnp.maximum(x, 0.0)
    y = jax.lax.conv_general_dilated(
        xr, conv_w, (stride, stride),
        [(padding, padding), (padding, padding)],
        dimension_numbers=("NCHW", "OIHW", "NCHW"),
    )
    mean = y.mean(axis=(0, 2, 3), keepdims=True)
    var = ((y - mean) ** 2).mean(axis=(0, 2, 3), keepdims=True)   # biased (train mode)
    return (y - mean) * jax.lax.rsqrt(var + eps) * gamma.reshape(1, -1, 1, 1) \
        + beta.reshape(1, -1, 1, 1)


if __name__ == "__main__":
    # ReLUConvBN(C_in=4, C_out=8, kernel_size=3, stride=1, padding=1, affine=True)
    N, C_IN, C_OUT, H, W = 2, 4, 8, 16, 16
    KH = KW = 3
    STRIDE, PADDING = 1, 1

    key = jax.random.PRNGKey(0)
    kx, kw_, kg, kb = jax.random.split(key, 4)
    x = jax.random.normal(kx, (N, C_IN, H, W), dtype=jnp.float32)
    conv_w = jax.random.normal(kw_, (C_OUT, C_IN, KH, KW), dtype=jnp.float32) * 0.1
    gamma = 1.0 + 0.1 * jax.random.normal(kg, (C_OUT,), dtype=jnp.float32)  # BN weight
    beta = 0.1 * jax.random.normal(kb, (C_OUT,), dtype=jnp.float32)         # BN bias

    out = relu_conv_bn(x, conv_w, gamma, beta, stride=STRIDE, padding=PADDING)
    out = jax.block_until_ready(out)

    ref = _ref_forward(x, conv_w, gamma, beta, stride=STRIDE, padding=PADDING)
    assert out.shape == (N, C_OUT, H, W), out.shape
    # Tolerance appropriate for bf16 MXU operands / bf16 intermediate (f32 accum).
    assert jnp.allclose(out, ref, rtol=2e-2, atol=2e-2), \
        float(jnp.max(jnp.abs(out - ref)))

    print("KERNEL_OK")
</pallas_src>

<mosaic_0001>
module attributes {stable_mosaic.version = 11 : i64} {
  func.func @_relu_conv_stats_kernel(%arg0: i32, %arg1: memref<2x4x384xbf16, #tpu.memory_space<vmem>>, %arg2: memref<8x36xbf16, #tpu.memory_space<vmem>>, %arg3: memref<1x288xf32, #tpu.memory_space<vmem>>, %arg4: memref<2x8x288xbf16, #tpu.memory_space<vmem>>, %arg5: memref<1x8x1xf32, #tpu.memory_space<vmem>>, %arg6: memref<1x8x1xf32, #tpu.memory_space<vmem>>, %arg7: memref<2x36x288xbf16, #tpu.memory_space<vmem>>) attributes {dimension_semantics = [#tpu.dimension_semantics<parallel>], iteration_bounds = array<i64: 1>, scalar_prefetch = 0 : i64, scratch_operands = 1 : i64, tpu.core_type = #tpu.core_type<tc>, window_params = [{transform_indices = @transform_0, window_bounds = array<i64: 2, 4, 384>}, {pipeline_mode = #tpu.pipeline_mode<synchronous>, transform_indices = @transform_1, window_bounds = array<i64: 8, 36>}, {pipeline_mode = #tpu.pipeline_mode<synchronous>, transform_indices = @transform_2, window_bounds = array<i64: 1, 288>}, {transform_indices = @transform_3, window_bounds = array<i64: 2, 8, 288>}, {transform_indices = @transform_4, window_bounds = array<i64: 1, 8, 1>}, {transform_indices = @transform_5, window_bounds = array<i64: 1, 8, 1>}]} {
    %c0 = arith.constant 0 : index
    %c0_0 = arith.constant 0 : index
    %c0_1 = arith.constant 0 : index
    %0 = vector.load %arg1[%c0, %c0_0, %c0_1] : memref<2x4x384xbf16, #tpu.memory_space<vmem>>, vector<2x4x288xbf16>
    %cst = arith.constant 0.000000e+00 : bf16
    %1 = vector.broadcast %cst : bf16 to vector<2x4x288xbf16>
    %2 = arith.maximumf %0, %1 : vector<2x4x288xbf16>
    %c0_2 = arith.constant 0 : index
    %c0_3 = arith.constant 0 : index
    %c0_4 = arith.constant 0 : index
    %3 = vector.load %arg7[%c0_2, %c0_3, %c0_4] : memref<2x36x288xbf16, #tpu.memory_space<vmem>>, vector<2x4x288xbf16>
    tpu.vector_store %arg7[%c0_2, %c0_3, %c0_4], %2 {strides = array<i32>} : memref<2x36x288xbf16, #tpu.memory_space<vmem>>, vector<2x4x288xbf16>,
    %c0_5 = arith.constant 0 : index
    %c0_6 = arith.constant 0 : index
    %c1 = arith.constant 1 : index
    %4 = vector.load %arg1[%c0_5, %c0_6, %c1] : memref<2x4x384xbf16, #tpu.memory_space<vmem>>, vector<2x4x288xbf16>
    %cst_7 = arith.constant 0.000000e+00 : bf16
    %5 = vector.broadcast %cst_7 : bf16 to vector<2x4x288xbf16>
    %6 = arith.maximumf %4, %5 : vector<2x4x288xbf16>
    %c0_8 = arith.constant 0 : index
    %c4 = arith.constant 4 : index
    %c0_9 = arith.constant 0 : index
    %7 = vector.load %arg7[%c0_8, %c4, %c0_9] : memref<2x36x288xbf16, #tpu.memory_space<vmem>>, vector<2x4x288xbf16>
    tpu.vector_store %arg7[%c0_8, %c4, %c0_9], %6 {strides = array<i32>} : memref<2x36x288xbf16, #tpu.memory_space<vmem>>, vector<2x4x288xbf16>,
    %c0_10 = arith.constant 0 : index
    %c0_11 = arith.constant 0 : index
    %c2 = arith.constant 2 : index
    %8 = vector.load %arg1[%c0_10, %c0_11, %c2] : memref<2x4x384xbf16, #tpu.memory_space<vmem>>, vector<2x4x288xbf16>
    %cst_12 = arith.constant 0.000000e+00 : bf16
    %9 = vector.broadcast %cst_12 : bf16 to vector<2x4x288xbf16>
    %10 = arith.maximumf %8, %9 : vector<2x4x288xbf16>
    %c0_13 = arith.constant 0 : index
    %c8 = arith.constant 8 : index
    %c0_14 = arith.constant 0 : index
    %11 = vector.load %arg7[%c0_13, %c8, %c0_14] : memref<2x36x288xbf16, #tpu.memory_space<vmem>>, vector<2x4x288xbf16>
    tpu.vector_store %arg7[%c0_13, %c8, %c0_14], %10 {strides = array<i32>} : memref<2x36x288xbf16, #tpu.memory_space<vmem>>, vector<2x4x288xbf16>,
    %c0_15 = arith.constant 0 : index
    %c0_16 = arith.constant 0 : index
    %c18 = arith.constant 18 : index
    %12 = vector.load %arg1[%c0_15, %c0_16, %c18] : memref<2x4x384xbf16, #tpu.memory_space<vmem>>, vector<2x4x288xbf16>
    %cst_17 = arith.constant 0.000000e+00 : bf16
    %13 = vector.broadcast %cst_17 : bf16 to vector<2x4x288xbf16>
    %14 = arith.maximumf %12, %13 : vector<2x4x288xbf16>
    %c0_18 = arith.constant 0 : index
    %c12 = arith.constant 12 : index
    %c0_19 = arith.constant 0 : index
    %15 = vector.load %arg7[%c0_18, %c12, %c0_19] : memref<2x36x288xbf16, #tpu.memory_space<vmem>>, vector<2x4x288xbf16>
    tpu.vector_store %arg7[%c0_18, %c12, %c0_19], %14 {strides = array<i32>} : memref<2x36x288xbf16, #tpu.memory_space<vmem>>, vector<2x4x288xbf16>,
    %c0_20 = arith.constant 0 : index
    %c0_21 = arith.constant 0 : index
    %c19 = arith.constant 19 : index
    %16 = vector.load %arg1[%c0_20, %c0_21, %c19] : memref<2x4x384xbf16, #tpu.memory_space<vmem>>, vector<2x4x288xbf16>
    %cst_22 = arith.constant 0.000000e+00 : bf16
    %17 = vector.broadcast %cst_22 : bf16 to vector<2x4x288xbf16>
    %18 = arith.maximumf %16, %17 : vector<2x4x288xbf16>
    %c0_23 = arith.constant 0 : index
    %c16 = arith.constant 16 : index
    %c0_24 = arith.constant 0 : index
    %19 = vector.load %arg7[%c0_23, %c16, %c0_24] : memref<2x36x288xbf16, #tpu.memory_space<vmem>>, vector<2x4x288xbf16>
    tpu.vector_store %arg7[%c0_23, %c16, %c0_24], %18 {strides = array<i32>} : memref<2x36x288xbf16, #tpu.memory_space<vmem>>, vector<2x4x288xbf16>,
    %c0_25 = arith.constant 0 : index
    %c0_26 = arith.constant 0 : index
    %c20 = arith.constant 20 : index
    %20 = vector.load %arg1[%c0_25, %c0_26, %c20] : memref<2x4x384xbf16, #tpu.memory_space<vmem>>, vector<2x4x288xbf16>
    %cst_27 = arith.constant 0.000000e+00 : bf16
    %21 = vector.broadcast %cst_27 : bf16 to vector<2x4x288xbf16>
    %22 = arith.maximumf %20, %21 : vector<2x4x288xbf16>
    %c0_28 = arith.constant 0 : index
    %c20_29 = arith.constant 20 : index
    %c0_30 = arith.constant 0 : index
    %23 = vector.load %arg7[%c0_28, %c20_29, %c0_30] : memref<2x36x288xbf16, #tpu.memory_space<vmem>>, vector<2x4x288xbf16>
    tpu.vector_store %arg7[%c0_28, %c20_29, %c0_30], %22 {strides = array<i32>} : memref<2x36x288xbf16, #tpu.memory_space<vmem>>, vector<2x4x288xbf16>,
    %c0_31 = arith.constant 0 : index
    %c0_32 = arith.constant 0 : index
    %c36 = arith.constant 36 : index
    %24 = vector.load %arg1[%c0_31, %c0_32, %c36] : memref<2x4x384xbf16, #tpu.memory_space<vmem>>, vector<2x4x288xbf16>
    %cst_33 = arith.constant 0.000000e+00 : bf16
    %25 = vector.broadcast %cst_33 : bf16 to vector<2x4x288xbf16>
    %26 = arith.maximumf %24, %25 : vector<2x4x288xbf16>
    %c0_34 = arith.constant 0 : index
    %c24 = arith.constant 24 : index
    %c0_35 = arith.constant 0 : index
    %27 = vector.load %arg7[%c0_34, %c24, %c0_35] : memref<2x36x288xbf16, #tpu.memory_space<vmem>>, vector<2x4x288xbf16>
    tpu.vector_store %arg7[%c0_34, %c24, %c0_35], %26 {strides = array<i32>} : memref<2x36x288xbf16, #tpu.memory_space<vmem>>, vector<2x4x288xbf16>,
    %c0_36 = arith.constant 0 : index
    %c0_37 = arith.constant 0 : index
    %c37 = arith.constant 37 : index
    %28 = vector.load %arg1[%c0_36, %c0_37, %c37] : memref<2x4x384xbf16, #tpu.memory_space<vmem>>, vector<2x4x288xbf16>
    %cst_38 = arith.constant 0.000000e+00 : bf16
    %29 = vector.broadcast %cst_38 : bf16 to vector<2x4x288xbf16>
    %30 = arith.maximumf %28, %29 : vector<2x4x288xbf16>
    %c0_39 = arith.constant 0 : index
    %c28 = arith.constant 28 : index
    %c0_40 = arith.constant 0 : index
    %31 = vector.load %arg7[%c0_39, %c28, %c0_40] : memref<2x36x288xbf16, #tpu.memory_space<vmem>>, vector<2x4x288xbf16>
    tpu.vector_store %arg7[%c0_39, %c28, %c0_40], %30 {strides = array<i32>} : memref<2x36x288xbf16, #tpu.memory_space<vmem>>, vector<2x4x288xbf16>,
    %c0_41 = arith.constant 0 : index
    %c0_42 = arith.constant 0 : index
    %c38 = arith.constant 38 : index
    %32 = vector.load %arg1[%c0_41, %c0_42, %c38] : memref<2x4x384xbf16, #tpu.memory_space<vmem>>, vector<2x4x288xbf16>
    %cst_43 = arith.constant 0.000000e+00 : bf16
    %33 = vector.broadcast %cst_43 : bf16 to vector<2x4x288xbf16>
    %34 = arith.maximumf %32, %33 : vector<2x4x288xbf16>
    %c0_44 = arith.constant 0 : index
    %c32 = arith.constant 32 : index
    %c0_45 = arith.constant 0 : index
    %35 = vector.load %arg7[%c0_44, %c32, %c0_45] : memref<2x36x288xbf16, #tpu.memory_space<vmem>>, vector<2x4x288xbf16>
    tpu.vector_store %arg7[%c0_44, %c32, %c0_45], %34 {strides = array<i32>} : memref<2x36x288xbf16, #tpu.memory_space<vmem>>, vector<2x4x288xbf16>,
    %c0_46 = arith.constant 0 : index
    %c0_47 = arith.constant 0 : index
    %36 = vector.load %arg2[%c0_46, %c0_47] : memref<8x36xbf16, #tpu.memory_space<vmem>>, vector<8x36xbf16>
    %c0_48 = arith.constant 0 : index
    %c0_49 = arith.constant 0 : index
    %37 = vector.load %arg3[%c0_48, %c0_49] : memref<1x288xf32, #tpu.memory_space<vmem>>, vector<1x288xf32>
    %cst_50 = arith.constant 0.000000e+00 : f32
    %38 = vector.broadcast %cst_50 : f32 to vector<8x1xf32>
    %cst_51 = arith.constant 0.000000e+00 : f32
    %39 = vector.broadcast %cst_51 : f32 to vector<8x1xf32>
    %c0_52 = arith.constant 0 : index
    %c0_53 = arith.constant 0 : index
    %c0_54 = arith.constant 0 : index
    %40 = vector.load %arg7[%c0_52, %c0_53, %c0_54] : memref<2x36x288xbf16, #tpu.memory_space<vmem>>, vector<1x36x288xbf16>
    %41 = vector.shape_cast %40 : vector<1x36x288xbf16> to vector<36x288xbf16>
    %cst_55 = arith.constant dense<0.000000e+00> : vector<8x288xf32>
    %42 = tpu.matmul %36, %41, %cst_55 {dimension_numbers = #tpu.dot_dimension_numbers<[1], [0], [0], [1], [0, 0, 1, 1], [], []>} : vector<8x36xbf16>, vector<36x288xbf16>, vector<8x288xf32> -> vector<8x288xf32>
    %43 = arith.truncf %42 : vector<8x288xf32> to vector<8x288xbf16>
    %c0_56 = arith.constant 0 : index
    %c0_57 = arith.constant 0 : index
    %c0_58 = arith.constant 0 : index
    %44 = vector.load %arg4[%c0_56, %c0_57, %c0_58] : memref<2x8x288xbf16, #tpu.memory_space<vmem>>, vector<1x8x288xbf16>
    %45 = vector.shape_cast %44 : vector<1x8x288xbf16> to vector<8x288xbf16>
    %46 = vector.shape_cast %43 : vector<8x288xbf16> to vector<1x8x288xbf16>
    tpu.vector_store %arg4[%c0_56, %c0_57, %c0_58], %46 {strides = array<i32>} : memref<2x8x288xbf16, #tpu.memory_space<vmem>>, vector<1x8x288xbf16>,
    %47 = arith.extf %43 : vector<8x288xbf16> to vector<8x288xf32>
    %48 = vector.broadcast %37 : vector<1x288xf32> to vector<8x288xf32>
    %49 = arith.mulf %47, %48 : vector<8x288xf32>
    %cst_59 = arith.constant dense<0.000000e+00> : vector<8xf32>
    %50 = vector.multi_reduction <add>, %49, %cst_59 [1] : vector<8x288xf32> to vector<8xf32>
    %51 = vector.shape_cast %50 : vector<8xf32> to vector<8x1xf32>
    %52 = arith.addf %38, %51 : vector<8x1xf32>
    %53 = arith.mulf %49, %47 : vector<8x288xf32>
    %cst_60 = arith.constant dense<0.000000e+00> : vector<8xf32>
    %54 = vector.multi_reduction <add>, %53, %cst_60 [1] : vector<8x288xf32> to vector<8xf32>
    %55 = vector.shape_cast %54 : vector<8xf32> to vector<8x1xf32>
    %56 = arith.addf %39, %55 : vector<8x1xf32>
    %c1_61 = arith.constant 1 : index
    %c0_62 = arith.constant 0 : index
    %c0_63 = arith.constant 0 : index
    %57 = vector.load %arg7[%c1_61, %c0_62, %c0_63] : memref<2x36x288xbf16, #tpu.memory_space<vmem>>, vector<1x36x288xbf16>
    %58 = vector.shape_cast %57 : vector<1x36x288xbf16> to vector<36x288xbf16>
    %cst_64 = arith.constant dense<0.000000e+00> : vector<8x288xf32>
    %59 = tpu.matmul %36, %58, %cst_64 {dimension_numbers = #tpu.dot_dimension_numbers<[1], [0], [0], [1], [0, 0, 1, 1], [], []>} : vector<8x36xbf16>, vector<36x288xbf16>, vector<8x288xf32> -> vector<8x288xf32>
    %60 = arith.truncf %59 : vector<8x288xf32> to vector<8x288xbf16>
    %c1_65 = arith.constant 1 : index
    %c0_66 = arith.constant 0 : index
    %c0_67 = arith.constant 0 : index
    %61 = vector.load %arg4[%c1_65, %c0_66, %c0_67] : memref<2x8x288xbf16, #tpu.memory_space<vmem>>, vector<1x8x288xbf16>
    %62 = vector.shape_cast %61 : vector<1x8x288xbf16> to vector<8x288xbf16>
    %63 = vector.shape_cast %60 : vector<8x288xbf16> to vector<1x8x288xbf16>
    tpu.vector_store %arg4[%c1_65, %c0_66, %c0_67], %63 {strides = array<i32>} : memref<2x8x288xbf16, #tpu.memory_space<vmem>>, vector<1x8x288xbf16>,
    %64 = arith.extf %60 : vector<8x288xbf16> to vector<8x288xf32>
    %65 = vector.broadcast %37 : vector<1x288xf32> to vector<8x288xf32>
    %66 = arith.mulf %64, %65 : vector<8x288xf32>
    %cst_68 = arith.constant dense<0.000000e+00> : vector<8xf32>
    %67 = vector.multi_reduction <add>, %66, %cst_68 [1] : vector<8x288xf32> to vector<8xf32>
    %68 = vector.shape_cast %67 : vector<8xf32> to vector<8x1xf32>
    %69 = arith.addf %52, %68 : vector<8x1xf32>
    %70 = arith.mulf %66, %64 : vector<8x288xf32>
    %cst_69 = arith.constant dense<0.000000e+00> : vector<8xf32>
    %71 = vector.multi_reduction <add>, %70, %cst_69 [1] : vector<8x288xf32> to vector<8xf32>
    %72 = vector.shape_cast %71 : vector<8xf32> to vector<8x1xf32>
    %73 = arith.addf %56, %72 : vector<8x1xf32>
    %c0_70 = arith.constant 0 : index
    %c0_71 = arith.constant 0 : index
    %c0_72 = arith.constant 0 : index
    %74 = vector.load %arg5[%c0_70, %c0_71, %c0_72] : memref<1x8x1xf32, #tpu.memory_space<vmem>>, vector<1x8x1xf32>
    %75 = vector.shape_cast %74 : vector<1x8x1xf32> to vector<8x1xf32>
    %76 = vector.shape_cast %69 : vector<8x1xf32> to vector<1x8x1xf32>
    tpu.vector_store %arg5[%c0_70, %c0_71, %c0_72], %76 {strides = array<i32>} : memref<1x8x1xf32, #tpu.memory_space<vmem>>, vector<1x8x1xf32>,
    %c0_73 = arith.constant 0 : index
    %c0_74 = arith.constant 0 : index
    %c0_75 = arith.constant 0 : index
    %77 = vector.load %arg6[%c0_73, %c0_74, %c0_75] : memref<1x8x1xf32, #tpu.memory_space<vmem>>, vector<1x8x1xf32>
    %78 = vector.shape_cast %77 : vector<1x8x1xf32> to vector<8x1xf32>
    %79 = vector.shape_cast %73 : vector<8x1xf32> to vector<1x8x1xf32>
    tpu.vector_store %arg6[%c0_73, %c0_74, %c0_75], %79 {strides = array<i32>} : memref<1x8x1xf32, #tpu.memory_space<vmem>>, vector<1x8x1xf32>,
    return
  }
  func.func @transform_0(%arg0: i32) -> (i32, i32, i32) {
    %c0_i32 = arith.constant 0 : i32
    %c0_i32_0 = arith.constant 0 : i32
    %c0_i32_1 = arith.constant 0 : i32
    return %arg0, %c0_i32, %c0_i32_0 : i32, i32, i32
  }
  func.func @transform_1(%arg0: i32) -> (i32, i32) {
    %c0_i32 = arith.constant 0 : i32
    %c0_i32_0 = arith.constant 0 : i32
    %c0_i32_1 = arith.constant 0 : i32
    return %c0_i32, %c0_i32_0 : i32, i32
  }
  func.func @transform_2(%arg0: i32) -> (i32, i32) {
    %c0_i32 = arith.constant 0 : i32
    %c0_i32_0 = arith.constant 0 : i32
    %c0_i32_1 = arith.constant 0 : i32
    return %c0_i32, %c0_i32_0 : i32, i32
  }
  func.func @transform_3(%arg0: i32) -> (i32, i32, i32) {
    %c0_i32 = arith.constant 0 : i32
    %c0_i32_0 = arith.constant 0 : i32
    %c0_i32_1 = arith.constant 0 : i32
    return %arg0, %c0_i32, %c0_i32_0 : i32, i32, i32
  }
  func.func @transform_4(%arg0: i32) -> (i32, i32, i32) {
    %c0_i32 = arith.constant 0 : i32
    %c0_i32_0 = arith.constant 0 : i32
    %c0_i32_1 = arith.constant 0 : i32
    return %arg0, %c0_i32, %c0_i32_0 : i32, i32, i32
  }
  func.func @transform_5(%arg0: i32) -> (i32, i32, i32) {
    %c0_i32 = arith.constant 0 : i32
    %c0_i32_0 = arith.constant 0 : i32
    %c0_i32_1 = arith.constant 0 : i32
    return %arg0, %c0_i32, %c0_i32_0 : i32, i32, i32
  }
}

module attributes {stable_mosaic.version = 11 : i64} {
  func.func @_bn_apply_kernel(%arg0: i32, %arg1: memref<2x8x256xbf16, #tpu.memory_space<vmem>>, %arg2: memref<8x1xf32, #tpu.memory_space<vmem>>, %arg3: memref<8x1xf32, #tpu.memory_space<vmem>>, %arg4: memref<2x8x256xf32, #tpu.memory_space<vmem>>) attributes {dimension_semantics = [#tpu.dimension_semantics<parallel>], iteration_bounds = array<i64: 1>, scalar_prefetch = 0 : i64, scratch_operands = 0 : i64, tpu.core_type = #tpu.core_type<tc>, window_params = [{transform_indices = @transform_0, window_bounds = array<i64: 2, 8, 256>}, {pipeline_mode = #tpu.pipeline_mode<synchronous>, transform_indices = @transform_1, window_bounds = array<i64: 8, 1>}, {pipeline_mode = #tpu.pipeline_mode<synchronous>, transform_indices = @transform_2, window_bounds = array<i64: 8, 1>}, {transform_indices = @transform_3, window_bounds = array<i64: 2, 8, 256>}]} {
    %c0 = arith.constant 0 : index
    %c0_0 = arith.constant 0 : index
    %c0_1 = arith.constant 0 : index
    %0 = vector.load %arg1[%c0, %c0_0, %c0_1] : memref<2x8x256xbf16, #tpu.memory_space<vmem>>, vector<2x8x256xbf16>
    %1 = arith.extf %0 : vector<2x8x256xbf16> to vector<2x8x256xf32>
    %c0_2 = arith.constant 0 : index
    %c0_3 = arith.constant 0 : index
    %2 = vector.load %arg2[%c0_2, %c0_3] : memref<8x1xf32, #tpu.memory_space<vmem>>, vector<8x1xf32>
    %3 = vector.shape_cast %2 : vector<8x1xf32> to vector<1x8x1xf32>
    %4 = vector.broadcast %3 : vector<1x8x1xf32> to vector<2x8x256xf32>
    %5 = arith.mulf %1, %4 : vector<2x8x256xf32>
    %c0_4 = arith.constant 0 : index
    %c0_5 = arith.constant 0 : index
    %6 = vector.load %arg3[%c0_4, %c0_5] : memref<8x1xf32, #tpu.memory_space<vmem>>, vector<8x1xf32>
    %7 = vector.shape_cast %6 : vector<8x1xf32> to vector<1x8x1xf32>
    %8 = vector.broadcast %7 : vector<1x8x1xf32> to vector<2x8x256xf32>
    %9 = arith.addf %5, %8 : vector<2x8x256xf32>
    %c0_6 = arith.constant 0 : index
    %c0_7 = arith.constant 0 : index
    %c0_8 = arith.constant 0 : index
    %10 = vector.load %arg4[%c0_6, %c0_7, %c0_8] : memref<2x8x256xf32, #tpu.memory_space<vmem>>, vector<2x8x256xf32>
    tpu.vector_store %arg4[%c0_6, %c0_7, %c0_8], %9 {strides = array<i32>} : memref<2x8x256xf32, #tpu.memory_space<vmem>>, vector<2x8x256xf32>,
    return
  }
  func.func @transform_0(%arg0: i32) -> (i32, i32, i32) {
    %c0_i32 = arith.constant 0 : i32
    %c0_i32_0 = arith.constant 0 : i32
    %c0_i32_1 = arith.constant 0 : i32
    return %arg0, %c0_i32, %c0_i32_0 : i32, i32, i32
  }
  func.func @transform_1(%arg0: i32) -> (i32, i32) {
    %c0_i32 = arith.constant 0 : i32
    %c0_i32_0 = arith.constant 0 : i32
    %c0_i32_1 = arith.constant 0 : i32
    return %c0_i32, %c0_i32_0 : i32, i32
  }
  func.func @transform_2(%arg0: i32) -> (i32, i32) {
    %c0_i32 = arith.constant 0 : i32
    %c0_i32_0 = arith.constant 0 : i32
    %c0_i32_1 = arith.constant 0 : i32
    return %c0_i32, %c0_i32_0 : i32, i32
  }
  func.func @transform_3(%arg0: i32) -> (i32, i32, i32) {
    %c0_i32 = arith.constant 0 : i32
    %c0_i32_0 = arith.constant 0 : i32
    %c0_i32_1 = arith.constant 0 : i32
    return %arg0, %c0_i32, %c0_i32_0 : i32, i32, i32
  }
}

</mosaic_0001>

<bundles_post_ra>
// kernel: relu_conv_bn.3
= control target key start
LH: loop header
LB: loop body
LE: loop exit
PB: predicated region body
PF: predicated region fallthrough
CT: control target
= control target key end

     0   :  { %v50_v0 = vmov 0   ;;  %s95_s1 = inlined_call_operand.vmem [shape: f32[8,1], index: 1, kind: input, shape index: {}]   ;;  %s96_s2 = inlined_call_operand.vmem [shape: f32[8,1], index: 2, kind: input, shape index: {}]   ;;  %s97_s0 = inlined_call_operand.vmem [shape: bf16[2,8,256], index: 0, kind: input, shape index: {}]   ;;  %s98_s3 = inlined_call_operand.vmem [shape: f32[2,8,256], index: 3, kind: output, shape index: {}]  }
   0x1   :  { %49 = vset.pattern.permute.xlu0 %v50_v0  ;;  %v20_v1 = vld [vmem:[%s95_s1] sm:$0xff]  ;;  %v15_v4 = vld [vmem:[%s97_s0 + $0x8] sm:$0xff] }
   0x2   :  { %23 = vperm.xlu0 %49, %v20_v1   ;;  %v30_v2 = vld [vmem:[%s96_s2] sm:$0xff]  ;;  %v18_v7 = vunpack.c.l.bf16 %v15_v4  ;;  %v19_v8 = vunpack.c.h.bf16 %v15_v4 }
   0x3   :  { %v14_v3 = vld [vmem:[%s97_s0] sm:$0xff] }
   0x4   :  { %v16_v5 = vunpack.c.l.bf16 %v14_v3  ;;  %v17_v6 = vunpack.c.h.bf16 %v14_v3 }
   0x6   :  { %33 = vperm.xlu0 %49, %v30_v2  }
  0x81   :  { %v24_v9 = vpop.permute.xlu0 %23 }
  0x82   :  { %v26_v10 = vmul.f32 %v24_v9, %v16_v5  ;;  %v27_v11 = vmul.f32 %v24_v9, %v17_v6  ;;  %v28_v12 = vmul.f32 %v24_v9, %v18_v7  ;;  %v29_v13 = vmul.f32 %v24_v9, %v19_v8 }
  0x85   :  { %v34_v14 = vpop.permute.xlu0 %33 }
  0x86   :  { %v36_v15 = vadd.f32 %v34_v14, %v26_v10  ;;  %v37_v16 = vadd.f32 %v34_v14, %v27_v11  ;;  %v38_v17 = vadd.f32 %v34_v14, %v28_v12  ;;  %v39_v18 = vadd.f32 %v34_v14, %v29_v13 }
  0x88   :  { %40 = vst [vmem:[%s98_s3] sm:$0xff] %v36_v15  ;;  %41 = vst [vmem:[%s98_s3 + $0x8] sm:$0xff] %v37_v16 }
  0x89   :  { %42 = vst [vmem:[%s98_s3 + $0x10] sm:$0xff] %v38_v17  ;;  %43 = vst [vmem:[%s98_s3 + $0x18] sm:$0xff] %v39_v18 }

// kernel: relu_conv_bn.2
= control target key start
LH: loop header
LB: loop body
LE: loop exit
PB: predicated region body
PF: predicated region fallthrough
CT: control target
= control target key end

     0   :  { %v35_v0 = vlaneseq  ;;  %v1042_v1 = vmov 1983009808   ;;  %v1043_v5 = vmov 0   ;;  %s1044_s26 = smov 126   ;;  %s1045_s27 = smov 127   ;;  %v1048_v40 = vmov 0.0   ;;  %s1338_s0 = inlined_call_operand.vmem [shape: bf16[2,4,384], index: 0, kind: input, shape index: {}]   ;;  %s1339_s1 = inlined_call_operand.vmem [shape: bf16[8,36], index: 1, kind: input, shape index: {}]   ;;  %s1340_s2 = inlined_call_operand.vmem [shape: f32[1,288], index: 2, kind: input, shape index: {}]   ;;  %s1341_s3 = inlined_call_operand.vmem [shape: bf16[2,8,288], index: 3, kind: output, shape index: {0}]   ;;  %s1342_s4 = inlined_call_operand.vmem [shape: f32[1,8,1], index: 4, kind: output, shape index: {1}]   ;;  %s1343_s5 = inlined_call_operand.vmem [shape: f32[1,8,1], index: 5, kind: output, shape index: {2}]  }
   0x1   :  { %v33_v2 = vunpack.c.l.s4 %v1042_v1  ;;  %v126_v3 = vld [vmem:[%s1338_s0] sm:$0x3f]  ;;  %651 = vmatprep.mubr.bf16.mxu0 %v1043_v5  ;;  %s1046_s7 = smov 110   ;;  %s1047_s12 = smov 109   ;;  %991 = vmatprep.subr.bf16.mxu1 %v1048_v40  ;;  %v19_v41 = vld [vmem:[%s1338_s0 + $0x6] sm:$0x3f] }
   0x2   :  { %v63_v4 = vld [vmem:[%s1338_s0] sm:$0x3f]  ;;  %v1091_v6 = vshrl.u32 %v35_v0, 7  ;;  %v128_v10 = vmax.bf16 %v1043_v5, %v126_v3  ;;  %v21_v43 = vmax.bf16 %v1043_v5, %v19_v41  ;;  %vm59_vm0 = vcmask 254976   ;;  %s1049_s17 = smov 108   ;;  %s1050_s20 = smov 92  }
   0x3   :  { %v65_v7 = vmax.bf16 %v1043_v5, %v63_v4  ;;  %v187_v8 = vld [vmem:[%s1338_s0] sm:$0x3f]  ;;  %v34_v9 = vunpack.c.0.s8 %v33_v2  ;;  %v64_v48 = vld [vmem:[%s1338_s0 + $0x6] sm:$0x3f]  ;;  %s1051_s23 = smov 91   ;;  %s1052_s28 = smov 90  }
   0x4   :  { %v132_v13 = vcombine.high %v128_v10, %v128_v10  ;;  %v189_v14 = vmax.bf16 %v1043_v5, %v187_v8  ;;  %v248_v15 = vld [vmem:[%s1338_s0] sm:$0x3f]  ;;  %v39_v50 = vcombine.high %v21_v43, %v21_v43  ;;  %948 = vst.sshfl [vmem:[#allocation2 + $0x3c] sm:$0xf pattern:$0x76325410] %v21_v43  ;;  %v66_v52 = vmax.bf16 %v1043_v5, %v64_v48 }
   0x5   :  { %v69_v11 = vcombine.low %v65_v7, %v65_v7  ;;  %v1099_v12 = vsub.s32 %v34_v9, %v1091_v6  ;;  %v250_v18 = vmax.bf16 %v1043_v5, %v248_v15  ;;  %v309_v22 = vld [vmem:[%s1338_s0] sm:$0x3f]  ;;  %v127_v56 = vld [vmem:[%s1338_s0 + $0x6] sm:$0x3f]  ;;  %vm1053_vm1 = vmmov 0  }
   0x6   :  { %v193_v21 = vcombine.low %v189_v14, %v189_v14  ;;  %v311_v23 = vmax.bf16 %v1043_v5, %v309_v22  ;;  %v370_v27 = vld [vmem:[%s1338_s0] sm:$0x3f]  ;;  %v129_v57 = vmax.bf16 %v1043_v5, %v127_v56  ;;  %v84_v60 = vcombine.low %v66_v52, %v66_v52  ;;  %v188_v61 = vld [vmem:[%s1338_s0 + $0x6] sm:$0x3f]  ;;  %997 = vmatprep.mubr.msk.bf16.mxu1 %vm1053_vm1, %v1048_v40 }
   0x7   :  { %v139_v16 = vrot.slane %v128_v10, %v1099_v12  ;;  %v76_v17 = vrot.slane %v69_v11, %v1099_v12  ;;  %v146_v19 = vrot.slane %v132_v13, %v1099_v12  ;;  %v83_v20 = vrot.slane %v65_v7, %v1099_v12  ;;  %v431_v32 = vld [vmem:[%s1338_s0] sm:$0x3f]  ;;  %v249_v2 = vld [vmem:[%s1338_s0 + $0x6] sm:$0x3f] }
   0x8   :  { %v207_v24 = vrot.slane %v189_v14, %v1099_v12  ;;  %v200_v25 = vrot.slane %v193_v21, %v1099_v12  ;;  %v254_v26 = vcombine.high %v250_v18, %v250_v18  ;;  %v372_v28 = vmax.bf16 %v1043_v5, %v370_v27  ;;  %v18_v33 = vld [vmem:[%s1338_s0] sm:$0x3f]  ;;  %v310_v9 = vld [vmem:[%s1338_s0 + $0x6] sm:$0x3f] }
   0x9   :  { %162 = vrot.lane.b32.xlu1 %v139_v16, %s1044_s26  ;;  %99 = vrot.lane.b32.xlu0 %v76_v17, %s1045_s27  ;;  %v261_v30 = vrot.slane %v250_v18, %v1099_v12  ;;  %v315_v31 = vcombine.low %v311_v23, %v311_v23  ;;  %v329_v34 = vrot.slane %v311_v23, %v1099_v12  ;;  %v492_v38 = vld [vmem:[%s1338_s0] sm:$0x3f]  ;;  %v371_v15 = vld [vmem:[%s1338_s0 + $0x6] sm:$0x3f]  ;;  %vm122_vm2 = vcmask 257026  }
   0xa   :  { %v268_v29 = vrot.slane %v254_v26, %v1099_v12  ;;  %v433_v35 = vmax.bf16 %v1043_v5, %v431_v32  ;;  %v376_v37 = vcombine.high %v372_v28, %v372_v28  ;;  %v20_v39 = vmax.bf16 %v1043_v5, %v18_v33 }
   0xb   :  { %v322_v36 = vrot.slane %v315_v31, %v1099_v12  ;;  %v383_v44 = vrot.slane %v372_v28, %v1099_v12  ;;  %v494_v46 = vmax.bf16 %v1043_v5, %v492_v38  ;;  %v53_v51 = vrot.slane %v39_v50, %v1099_v12 }
   0xc   :  { %v24_v42 = vcombine.high %v20_v39, %v20_v39  ;;  %947 = vst.sshfl [vmem:[#allocation2] sm:$0xf pattern:$0x76325410] %v20_v39  ;;  %v437_v45 = vcombine.low %v433_v35, %v433_v35  ;;  %v390_v47 = vrot.slane %v376_v37, %v1099_v12  ;;  %v451_v53 = vrot.slane %v433_v35, %v1099_v12 }
   0xd   :  { %164 = vrot.lane.b32.xlu1 %v146_v19, %s1044_s26  ;;  %101 = vrot.lane.b32.xlu0 %v83_v20, %s1045_s27  ;;  %v498_v55 = vcombine.high %v494_v46, %v494_v46  ;;  %62 = vst.msk [vmem:[#allocation2 + $0x44] sm:$0x3] %vm59_vm0, %v53_v51  ;;  %v505_v59 = vrot.slane %v494_v46, %v1099_v12  ;;  %v432_v20 = vld [vmem:[%s1338_s0 + $0x6] sm:$0x3f]  ;;  %vm111_vm3 = vcmask 1043456   ;;  %vm175_vm4 = vcmask 1031168  }
   0xe   :  { %v38_v49 = vrot.slane %v24_v42, %v1099_v12  ;;  %v444_v54 = vrot.slane %v437_v45, %v1099_v12  ;;  %v98_v62 = vrot.slane %v66_v52, %v1099_v12  ;;  %v91_v63 = vrot.slane %v84_v60, %v1099_v12 }
   0xf   :  { %v512_v58 = vrot.slane %v498_v55, %v1099_v12  ;;  %v147_v0 = vcombine.high %v129_v57, %v129_v57  ;;  %v190_v1 = vmax.bf16 %v1043_v5, %v188_v61  ;;  %v154_v3 = vrot.slane %v129_v57, %v1099_v12 }
  0x10   :  { %60 = vst.msk [vmem:[#allocation2 + $0x8] sm:$0x3] %vm59_vm0, %v38_v49  ;;  %v251_v8 = vmax.bf16 %v1043_v5, %v249_v2  ;;  %v312_v10 = vmax.bf16 %v1043_v5, %v310_v9  ;;  %v373_v16 = vmax.bf16 %v1043_v5, %v371_v15  ;;  %v434_v21 = vmax.bf16 %v1043_v5, %v432_v20 }
  0x11   :  { %225 = vrot.lane.b32.xlu1 %v207_v24, %s1046_s7  ;;  %223 = vrot.lane.b32.xlu0 %v200_v25, %s1046_s7  ;;  %v161_v4 = vrot.slane %v147_v0, %v1099_v12  ;;  %v208_v7 = vcombine.low %v190_v1, %v190_v1  ;;  %v222_v11 = vrot.slane %v190_v1, %v1099_v12  ;;  %v493_v25 = vld [vmem:[%s1338_s0 + $0x6] sm:$0x3f]  ;;  %vm113_vm5 = vcmask 1039360  }
  0x12   :  { %v269_v14 = vcombine.high %v251_v8, %v251_v8  ;;  %v276_v18 = vrot.slane %v251_v8, %v1099_v12  ;;  %v330_v19 = vcombine.low %v312_v10, %v312_v10  ;;  %v344_v22 = vrot.slane %v312_v10, %v1099_v12 }
  0x13   :  { %v215_v13 = vrot.slane %v208_v7, %v1099_v12  ;;  %v391_v24 = vcombine.high %v373_v16, %v373_v16  ;;  %v398_v26 = vrot.slane %v373_v16, %v1099_v12  ;;  %v452_v28 = vcombine.low %v434_v21, %v434_v21 }
  0x14   :  { %v283_v17 = vrot.slane %v269_v14, %v1099_v12  ;;  %v337_v23 = vrot.slane %v330_v19, %v1099_v12  ;;  %vm236_vm6 = vcmask 900096   ;;  %vm297_vm7 = vcmask 891904  }
  0x15   :  { %286 = vrot.lane.b32.xlu1 %v268_v29, %s1047_s12  ;;  %284 = vrot.lane.b32.xlu0 %v261_v30, %s1047_s12  ;;  %v405_v27 = vrot.slane %v391_v24, %v1099_v12  ;;  %v495_v29 = vmax.bf16 %v1043_v5, %v493_v25  ;;  %v466_v30 = vrot.slane %v434_v21, %v1099_v12  ;;  %vm358_vm8 = vcmask 883712  }
  0x16   :  { %v459_v31 = vrot.slane %v452_v28, %v1099_v12  ;;  %vm419_vm9 = vcmask 752640   ;;  %vm480_vm10 = vcmask 744448   ;;  %vm541_vm11 = vcmask 736256  }
  0x17   :  { %v513_v32 = vcombine.high %v495_v29, %v495_v29  ;;  %vm609_vm12 = vcmask 1041408   ;;  %vm605_vm13 = vcmask 293888   ;;  %vm714_vm14 = vcmask 257024  }
  0x18   :  { %vm739_vm15 = vcmask 261120  }
  0x19   :  { %347 = vrot.lane.b32.xlu1 %v329_v34, %s1049_s17  ;;  %345 = vrot.lane.b32.xlu0 %v322_v36, %s1049_s17  ;;  %v527_v33 = vrot.slane %v513_v32, %v1099_v12  ;;  %v520_v34 = vrot.slane %v495_v29, %v1099_v12 }
  0x1d   :  { %408 = vrot.lane.b32.xlu1 %v390_v47, %s1050_s20  ;;  %406 = vrot.lane.b32.xlu0 %v383_v44, %s1050_s20 }
  0x21   :  { %469 = vrot.lane.b32.xlu1 %v451_v53, %s1051_s23  ;;  %467 = vrot.lane.b32.xlu0 %v444_v54, %s1051_s23 }
  0x25   :  { %530 = vrot.lane.b32.xlu1 %v512_v58, %s1052_s28  ;;  %528 = vrot.lane.b32.xlu0 %v505_v59, %s1052_s28 }
  0x29   :  { %105 = vrot.lane.b32.xlu1 %v98_v62, %s1045_s27  ;;  %103 = vrot.lane.b32.xlu0 %v91_v63, %s1045_s27 }
  0x2d   :  { %168 = vrot.lane.b32.xlu1 %v161_v4, %s1044_s26  ;;  %166 = vrot.lane.b32.xlu0 %v154_v3, %s1044_s26 }
  0x31   :  { %229 = vrot.lane.b32.xlu1 %v222_v11, %s1046_s7  ;;  %227 = vrot.lane.b32.xlu0 %v215_v13, %s1046_s7 }
  0x35   :  { %290 = vrot.lane.b32.xlu1 %v283_v17, %s1047_s12  ;;  %288 = vrot.lane.b32.xlu0 %v276_v18, %s1047_s12 }
  0x39   :  { %351 = vrot.lane.b32.xlu1 %v344_v22, %s1049_s17  ;;  %349 = vrot.lane.b32.xlu0 %v337_v23, %s1049_s17 }
  0x3d   :  { %412 = vrot.lane.b32.xlu1 %v405_v27, %s1050_s20  ;;  %410 = vrot.lane.b32.xlu0 %v398_v26, %s1050_s20 }
  0x41   :  { %473 = vrot.lane.b32.xlu1 %v466_v30, %s1051_s23  ;;  %471 = vrot.lane.b32.xlu0 %v459_v31, %s1051_s23 }
  0x45   :  { %534 = vrot.lane.b32.xlu1 %v527_v33, %s1052_s28  ;;  %532 = vrot.lane.b32.xlu0 %v520_v34, %s1052_s28 }
  0x7b   :  { %v163_v35 = vpop.permute.xlu1 %162  ;;  %v100_v36 = vpop.permute.xlu0 %99 }
  0x7c   :  { %v170_v39 = vrot.slane %v163_v35, 4  ;;  %v107_v41 = vrot.slane %v100_v36, 4 }
  0x7f   :  { %v165_v37 = vpop.permute.xlu1 %164  ;;  %v102_v38 = vpop.permute.xlu0 %101 }
  0x80   :  { %v171_v42 = vrot.slane %v165_v37, 4  ;;  %184 = vst.msk [vmem:[#allocation2 + $0x14] sm:$0x3] %vm59_vm0, %v165_v37  ;;  %v108_v43 = vrot.slane %v102_v38, 4 }
  0x81   :  { %123 = vst.msk [vmem:[#allocation2 + $0x8] sm:$0xc] %vm122_vm2, %v102_v38 }
  0x82   :  { %v174_v12 = vsel %vm111_vm3, %v170_v39, %v171_v42  ;;  %v112_v44 = vsel %vm111_vm3, %v107_v41, %v108_v43 }
  0x83   :  { %v176_v45 = vsel %vm175_vm4, %v163_v35, %v174_v12  ;;  %v114_v46 = vsel %vm113_vm5, %v100_v36, %v112_v44  ;;  %v226_v47 = vpop.permute.xlu1 %225  ;;  %v224_v48 = vpop.permute.xlu0 %223 }
  0x84   :  { %183 = vst [vmem:[#allocation2 + $0xc] sm:$0x33] %v176_v45  ;;  %121 = vst [vmem:[#allocation2] sm:$0xcc] %v114_v46  ;;  %v232_v49 = vrot.slane %v226_v47, 4  ;;  %v231_v50 = vrot.slane %v224_v48, 4 }
  0x85   :  { %245 = vst.msk [vmem:[#allocation2 + $0x14] sm:$0xc] %vm122_vm2, %v226_v47  ;;  %v1268_v45 = vld [vmem:[%s1339_s1] sm:$0xf] }
  0x86   :  { %v235_v51 = vsel %vm111_vm3, %v231_v50, %v232_v49 }
  0x87   :  { %v237_v52 = vsel %vm236_vm6, %v224_v48, %v235_v51  ;;  %v287_v53 = vpop.permute.xlu1 %286  ;;  %v285_v54 = vpop.permute.xlu0 %284 }
  0x88   :  { %244 = vst [vmem:[#allocation2 + $0xc] sm:$0xcc] %v237_v52  ;;  %v293_v55 = vrot.slane %v287_v53, 4  ;;  %306 = vst.msk [vmem:[#allocation2 + $0x20] sm:$0x3] %vm59_vm0, %v287_v53  ;;  %v292_v56 = vrot.slane %v285_v54, 4 }
  0x8a   :  { %v296_v57 = vsel %vm111_vm3, %v292_v56, %v293_v55 }
  0x8b   :  { %v298_v58 = vsel %vm297_vm7, %v285_v54, %v296_v57  ;;  %v348_v59 = vpop.permute.xlu1 %347  ;;  %v346_v60 = vpop.permute.xlu0 %345  ;;  %v555_v4 = vld [vmem:[#allocation2] sm:$0xff] }
  0x8c   :  { %v1023_v61 = vld [vmem:[#allocation2 + $0x8] ss:$12 sps:$4 sm:$0xff]   ;;  %305 = vst [vmem:[#allocation2 + $0x18] sm:$0x33] %v298_v58  ;;  %v354_v62 = vrot.slane %v348_v59, 4  ;;  %v353_v63 = vrot.slane %v346_v60, 4 }
  0x8d   :  { %367 = vst.msk [vmem:[#allocation2 + $0x20] sm:$0xc] %vm122_vm2, %v348_v59  ;;  %992 = vmatpush3.bf16.msra.mxu1 %v1023_v61 }
  0x8e   :  { %v357_v0 = vsel %vm111_vm3, %v353_v63, %v354_v62  ;;  %993 = vmatprep.subr.bf16.mxu1 %v1048_v40 }
  0x8f   :  { %v359_v1 = vsel %vm358_vm8, %v346_v60, %v357_v0  ;;  %v409_v2 = vpop.permute.xlu1 %408  ;;  %v407_v3 = vpop.permute.xlu0 %406  ;;  %v557_v7 = vld [vmem:[#allocation2 + $0xc] sm:$0xff] }
  0x90   :  { %v1024_v8 = vld [vmem:[#allocation2 + $0x4] ss:$12 sps:$4 sm:$0xff]   ;;  %366 = vst [vmem:[#allocation2 + $0x18] sm:$0xcc] %v359_v1  ;;  %v415_v9 = vrot.slane %v409_v2, 4  ;;  %v414_v10 = vrot.slane %v407_v3, 4  ;;  %v949_v11 = vcombine.low %v555_v4, %v557_v7 }
  0x91   :  { %428 = vst.msk [vmem:[#allocation2 + $0x2c] sm:$0x3] %vm59_vm0, %v409_v2  ;;  %619 = vmatprep.subr.bf16.mxu0 %v1024_v8 }
  0x92   :  { %v418_v13 = vsel %vm111_vm3, %v414_v10, %v415_v9  ;;  %620 = vmatpush1.bf16.msra.mxu0 %v949_v11 }
  0x93   :  { %v420_v14 = vsel %vm419_vm9, %v407_v3, %v418_v13  ;;  %v470_v15 = vpop.permute.xlu1 %469  ;;  %v468_v16 = vpop.permute.xlu0 %467 }
  0x94   :  { %427 = vst [vmem:[#allocation2 + $0x24] sm:$0x33] %v420_v14  ;;  %v476_v17 = vrot.slane %v470_v15, 4  ;;  %489 = vst.msk [vmem:[#allocation2 + $0x2c] sm:$0xc] %vm122_vm2, %v470_v15  ;;  %v475_v18 = vrot.slane %v468_v16, 4 }
  0x96   :  { %v479_v19 = vsel %vm111_vm3, %v475_v18, %v476_v17 }
  0x97   :  { %v481_v20 = vsel %vm480_vm10, %v468_v16, %v479_v19  ;;  %v531_v21 = vpop.permute.xlu1 %530  ;;  %v529_v22 = vpop.permute.xlu0 %528  ;;  %v559_v33 = vld [vmem:[#allocation2 + $0x18] sm:$0xff] }
  0x98   :  { %488 = vst [vmem:[#allocation2 + $0x24] sm:$0xcc] %v481_v20  ;;  %v537_v23 = vrot.slane %v531_v21, 4  ;;  %550 = vst.msk [vmem:[#allocation2 + $0x38] sm:$0x3] %vm59_vm0, %v531_v21  ;;  %v536_v24 = vrot.slane %v529_v22, 4 }
  0x9a   :  { %v540_v25 = vsel %vm111_vm3, %v536_v24, %v537_v23 }
  0x9b   :  { %v542_v26 = vsel %vm541_vm11, %v529_v22, %v540_v25  ;;  %v106_v27 = vpop.permute.xlu1 %105  ;;  %v104_v28 = vpop.permute.xlu0 %103  ;;  %v1026_v29 = vld [vmem:[#allocation2 + $0x20] ss:$12 sps:$4 sm:$0xff]  }
  0x9c   :  { %549 = vst [vmem:[#allocation2 + $0x30] sm:$0x33] %v542_v26  ;;  %v110_v30 = vrot.slane %v106_v27, 4  ;;  %125 = vst.msk [vmem:[#allocation2 + $0x44] sm:$0xc] %vm122_vm2, %v106_v27  ;;  %v109_v31 = vrot.slane %v104_v28, 4  ;;  %994 = vmatpush3.bf16.msra.mxu1 %v1026_v29 }
  0x9d   :  { %995 = vmatprep.subr.bf16.mxu1 %v1048_v40 }
  0x9e   :  { %v115_v32 = vsel %vm111_vm3, %v109_v31, %v110_v30 }
  0x9f   :  { %v116_v34 = vsel %vm113_vm5, %v104_v28, %v115_v32  ;;  %v169_v35 = vpop.permute.xlu1 %168  ;;  %v167_v36 = vpop.permute.xlu0 %166  ;;  %v561_v37 = vld [vmem:[#allocation2 + $0x24] sm:$0xff]  ;;  %v1029_v43 = vld [vmem:[#allocation2 + $0x38] ss:$0 sps:$4 sm:$0x33]  }
  0xa0   :  { %v1027_v38 = vld [vmem:[#allocation2 + $0x1c] ss:$12 sps:$4 sm:$0xff]   ;;  %124 = vst [vmem:[#allocation2 + $0x3c] sm:$0xcc] %v116_v34  ;;  %v173_v39 = vrot.slane %v169_v35, 4  ;;  %v172_v41 = vrot.slane %v167_v36, 4  ;;  %v952_v42 = vcombine.low %v559_v33, %v561_v37 }
  0xa1   :  { %186 = vst.msk [vmem:[#allocation2 + $0x50] sm:$0x3] %vm59_vm0, %v169_v35  ;;  %621 = vmatprep.subr.bf16.mxu0 %v1027_v38  ;;  %v617_v44 = vsel %vm609_vm12, %v1029_v43, 0  ;;  %v554_v37 = vld [vmem:[%s1340_s2] sm:$0x7] }
  0xa2   :  { %v177_v12 = vsel %vm111_vm3, %v172_v41, %v173_v39  ;;  %622 = vmatpush1.bf16.msra.mxu0 %v952_v42  ;;  %996 = vmatpush3.bf16.msra.mxu1 %v617_v44  ;;  %v722_v39 = vsub.s32 0, %v1091_v6 }
  0xa3   :  { %v178_v46 = vsel %vm175_vm4, %v167_v36, %v177_v12  ;;  %v230_v47 = vpop.permute.xlu1 %229  ;;  %v228_v48 = vpop.permute.xlu0 %227  ;;  %v563_v49 = vld [vmem:[#allocation2 + $0x30] sm:$0x33]  ;;  %1001 = vmatprep.subr.bf16.mxu1 %v1048_v40  ;;  %v726_v12 = vsub.s32 1, %v1091_v6 }
  0xa4   :  { %185 = vst [vmem:[#allocation2 + $0x48] sm:$0x33] %v178_v46  ;;  %v234_v50 = vrot.slane %v230_v47, 4  ;;  %247 = vst.msk [vmem:[#allocation2 + $0x50] sm:$0xc] %vm122_vm2, %v230_v47  ;;  %v233_v51 = vrot.slane %v228_v48, 4  ;;  %v956_v52 = vcombine.high %v563_v49, %v563_v49  ;;  %v955_v53 = vcombine.low %v563_v49, %v563_v49 }
  0xa5   :  { %998 = vmatmul.mubr.msk.bf16.vlgmr.msra.gmra.mrb[0].mxu1 %vm605_vm13, %v1268_v45  ;;  %v723_v49 = vrot.slane %v554_v37, %v722_v39 }
  0xa6   :  { %v238_v54 = vsel %vm111_vm3, %v233_v51, %v234_v50  ;;  %958 = vmatprep.subr.msk.bf16.mxu0 %vm609_vm12, %v956_v52  ;;  %v611_v55 = vsel %vm609_vm12, %v955_v53, 0  ;;  %1007 = vmatprep.mubr.msk.bf16.mxu1 %vm1053_vm1, %v1048_v40 }
  0xa7   :  { %v239_v56 = vsel %vm236_vm6, %v228_v48, %v238_v54  ;;  %v291_v57 = vpop.permute.xlu1 %290  ;;  %v289_v58 = vpop.permute.xlu0 %288  ;;  %624 = vmatpush1.bf16.msra.mxu0 %v611_v55  ;;  %v727_v54 = vrot.slane %v554_v37, %v726_v12 }
  0xa8   :  { %246 = vst [vmem:[#allocation2 + $0x48] sm:$0xcc] %v239_v56  ;;  %v295_v59 = vrot.slane %v291_v57, 4  ;;  %308 = vst.msk [vmem:[#allocation2 + $0x5c] sm:$0x3] %vm59_vm0, %v291_v57  ;;  %v294_v60 = vrot.slane %v289_v58, 4 }
  0xaa   :  { %v299_v61 = vsel %vm111_vm3, %v294_v60, %v295_v59  ;;  %959 = vmatmul.mubr.msk.bf16.vlgmr.msra.gmra.mrb[0].mxu0 %vm605_vm13, %v1268_v45 }
  0xab   :  { %v300_v62 = vsel %vm297_vm7, %v289_v58, %v299_v61  ;;  %v352_v63 = vpop.permute.xlu1 %351  ;;  %v350_v0 = vpop.permute.xlu0 %349  ;;  %v1031_v1 = vld [vmem:[#allocation2 + $0x44] ss:$12 sps:$4 sm:$0xff]   ;;  %846 = vmatprep.mubr.bf16.mxu0 %v1043_v5 }
  0xac   :  { %307 = vst [vmem:[#allocation2 + $0x54] sm:$0x33] %v300_v62  ;;  %v356_v2 = vrot.slane %v352_v63, 4  ;;  %369 = vst.msk [vmem:[#allocation2 + $0x5c] sm:$0xc] %vm122_vm2, %v352_v63  ;;  %v355_v3 = vrot.slane %v350_v0, 4  ;;  %1002 = vmatpush3.bf16.msra.mxu1 %v1031_v1 }
  0xad   :  { %1003 = vmatprep.subr.bf16.mxu1 %v1048_v40 }
  0xae   :  { %v360_v4 = vsel %vm111_vm3, %v355_v3, %v356_v2 }
  0xaf   :  { %v361_v7 = vsel %vm358_vm8, %v350_v0, %v360_v4  ;;  %v413_v8 = vpop.permute.xlu1 %412  ;;  %v411_v9 = vpop.permute.xlu0 %410  ;;  %v1032_v10 = vld [vmem:[#allocation2 + $0x3c] ss:$12 sps:$4 sm:$0xff]   ;;  %v1034_v11 = vld [vmem:[#allocation2 + $0x40] ss:$12 sps:$4 sm:$0xff]  }
  0xb0   :  { %368 = vst [vmem:[#allocation2 + $0x54] sm:$0xcc] %v361_v7  ;;  %v417_v13 = vrot.slane %v413_v8, 4  ;;  %430 = vst.msk [vmem:[#allocation2 + $0x68] sm:$0x3] %vm59_vm0, %v413_v8  ;;  %v416_v5 = vrot.slane %v411_v9, 4  ;;  %814 = vmatprep.subr.bf16.mxu0 %v1034_v11 }
  0xb1   :  { %815 = vmatpush1.bf16.msra.mxu0 %v1032_v10 }
  0xb2   :  { %v421_v14 = vsel %vm111_vm3, %v416_v5, %v417_v13 }
  0xb3   :  { %v422_v15 = vsel %vm419_vm9, %v411_v9, %v421_v14  ;;  %v474_v16 = vpop.permute.xlu1 %473  ;;  %v472_v17 = vpop.permute.xlu0 %471 }
  0xb4   :  { %429 = vst [vmem:[#allocation2 + $0x60] sm:$0x33] %v422_v15  ;;  %v478_v18 = vrot.slane %v474_v16, 4  ;;  %491 = vst.msk [vmem:[#allocation2 + $0x68] sm:$0xc] %vm122_vm2, %v474_v16  ;;  %v477_v19 = vrot.slane %v472_v17, 4 }
  0xb6   :  { %v482_v20 = vsel %vm111_vm3, %v477_v19, %v478_v18 }
  0xb7   :  { %v483_v21 = vsel %vm480_vm10, %v472_v17, %v482_v20  ;;  %v535_v22 = vpop.permute.xlu1 %534  ;;  %v533_v23 = vpop.permute.xlu0 %532 }
  0xb8   :  { %490 = vst [vmem:[#allocation2 + $0x60] sm:$0xcc] %v483_v21  ;;  %v539_v24 = vrot.slane %v535_v22, 4  ;;  %552 = vst.msk [vmem:[#allocation2 + $0x74] sm:$0x3] %vm59_vm0, %v535_v22  ;;  %v538_v25 = vrot.slane %v533_v23, 4 }
  0xb9   :  { %vm932_vm0 = vcmask 7168  }
  0xba   :  { %v543_v26 = vsel %vm111_vm3, %v538_v25, %v539_v24 }
  0xbb   :  { %v544_v27 = vsel %vm541_vm11, %v533_v23, %v543_v26  ;;  %v1035_v28 = vld [vmem:[#allocation2 + $0x5c] ss:$12 sps:$4 sm:$0xff]  }
  0xbc   :  { %551 = vst [vmem:[#allocation2 + $0x6c] sm:$0x33] %v544_v27  ;;  %1004 = vmatpush3.bf16.msra.mxu1 %v1035_v28 }
  0xbd   :  { %1005 = vmatprep.subr.bf16.mxu1 %v1048_v40  ;;  %v730_v40 = vsub.s32 2, %v1091_v6 }
  0xbf   :  { %v1036_v29 = vld [vmem:[#allocation2 + $0x54] ss:$12 sps:$4 sm:$0xff]   ;;  %v1038_v30 = vld [vmem:[#allocation2 + $0x58] ss:$12 sps:$4 sm:$0xff]   ;;  %v731_v42 = vrot.slane %v554_v37, %v730_v40 }
  0xc0   :  { %v1039_v31 = vld [vmem:[#allocation2 + $0x74] ss:$0 sps:$4 sm:$0x33]   ;;  %816 = vmatprep.subr.bf16.mxu0 %v1038_v30 }
  0xc1   :  { %817 = vmatpush1.bf16.msra.mxu0 %v1036_v29  ;;  %v812_v32 = vsel %vm609_vm12, %v1039_v31, 0 }
  0xc2   :  { %1006 = vmatpush3.bf16.msra.mxu1 %v812_v32 }
  0xc3   :  { %v763_v33 = vld [vmem:[#allocation2 + $0x6c] sm:$0x33] }
  0xc4   :  { %v970_v34 = vcombine.high %v763_v33, %v763_v33  ;;  %v969_v35 = vcombine.low %v763_v33, %v763_v33 }
  0xc5   :  { %1008 = vmatmul.mubr.msk.bf16.vlgmr.msra.gmra.mrb[4].mxu1 %vm605_vm13, %v1268_v45 }
  0xc6   :  { %972 = vmatprep.subr.msk.bf16.mxu0 %vm609_vm12, %v970_v34  ;;  %v806_v36 = vsel %vm609_vm12, %v969_v35, 0 }
  0xc7   :  { %819 = vmatpush1.bf16.msra.mxu0 %v806_v36 }
  0xca   :  { %973 = vmatmul.mubr.msk.bf16.vlgmr.msra.gmra.mrb[4].mxu0 %vm605_vm13, %v1268_v45 }
 0x178   :  { %v694_v38 = vpop.f32.mrb[0].mxu1 }
 0x179   :  { %v702_v41 = vpack.c.bf16 %v694_v38, %v694_v38  ;;  %v999_v43 = vpop.f32.mrb[1].mxu1 }
 0x17a   :  { %v697_v44 = vpop.f32.mrb[2].mxu1 }
 0x17b   :  { %715 = vst.msk [vmem:[%s1341_s3 + $0x8] sm:$0xf] %vm714_vm14, %v702_v41  ;;  %v718_v45 = vunpack.c.l.bf16 %v702_v41  ;;  %v1000_v46 = vpop.f32.mrb[3].mxu1 }
 0x17d   :  { %v653_v47 = vpop.f32.mrb[0].mxu0  ;;  %v737_v51 = vmul.f32 %v731_v42, %v718_v45 }
 0x17e   :  { %v700_v48 = vpack.c.bf16 %v653_v47, %v653_v47  ;;  %v655_v50 = vpop.f32.mrb[1].mxu0 }
 0x17f   :  { %v701_v52 = vpack.c.bf16 %v655_v50, %v655_v50  ;;  %v979_v53 = vpack.c.bf16 %v655_v50, %v653_v47  ;;  %v657_v55 = vpop.f32.mrb[2].mxu0  ;;  %v747_v59 = vmul.f32 %v737_v51, %v718_v45  ;;  %v740_v62 = vsel %vm739_vm15, %v737_v51, 0.0 }
 0x180   :  { %v716_v56 = vunpack.c.l.bf16 %v700_v48  ;;  %v658_v57 = vpop.f32.mrb[3].mxu0 }
 0x181   :  { %713 = vst [vmem:[%s1341_s3] sm:$0xff] %v979_v53  ;;  %v717_v6 = vunpack.c.l.bf16 %v701_v52  ;;  %v749_v1 = vsel %vm739_vm15, %v747_v59, 0.0 }
 0x182   :  { %v735_v58 = vmul.f32 %v723_v49, %v716_v56 }
 0x183   :  { %v736_v60 = vmul.f32 %v727_v54, %v717_v6 }
 0x184   :  { %v745_v61 = vmul.f32 %v735_v58, %v716_v56 }
 0x185   :  { %v746_v63 = vmul.f32 %v736_v60, %v717_v6  ;;  %v738_v0 = vadd.f32 %v736_v60, %v735_v58 }
 0x187   :  { %v748_v2 = vadd.f32 %v746_v63, %v745_v61  ;;  %v741_v3 = vadd.f32 %v740_v62, %v738_v0 }
 0x189   :  { %v750_v4 = vadd.f32 %v749_v1, %v748_v2  ;;  %742 = vadd.xlane.f32.xlu0 %v741_v3 }
 0x18b   :  { %751 = vadd.xlane.f32.xlu1 %v750_v4 }
 0x198   :  { %v889_v7 = vpop.f32.mrb[4].mxu1 }
 0x199   :  { %v897_v8 = vpack.c.bf16 %v889_v7, %v889_v7  ;;  %v1009_v9 = vpop.f32.mrb[5].mxu1 }
 0x19a   :  { %v892_v10 = vpop.f32.mrb[6].mxu1 }
 0x19b   :  { %978 = vst.msk [vmem:[%s1341_s3 + $0x14] sm:$0xf] %vm714_vm14, %v897_v8  ;;  %v913_v11 = vunpack.c.l.bf16 %v897_v8  ;;  %v1010_v13 = vpop.f32.mrb[7].mxu1 }
 0x19d   :  { %v848_v5 = vpop.f32.mrb[4].mxu0  ;;  %v916_v21 = vmul.f32 %v913_v11, %v731_v42 }
 0x19e   :  { %v895_v14 = vpack.c.bf16 %v848_v5, %v848_v5  ;;  %v850_v15 = vpop.f32.mrb[5].mxu0 }
 0x19f   :  { %v896_v16 = vpack.c.bf16 %v850_v15, %v850_v15  ;;  %v981_v17 = vpack.c.bf16 %v850_v15, %v848_v5  ;;  %v852_v18 = vpop.f32.mrb[6].mxu0  ;;  %v918_v26 = vsel %vm739_vm15, %v916_v21, 0.0  ;;  %v925_v27 = vmul.f32 %v916_v21, %v913_v11 }
 0x1a0   :  { %v911_v19 = vunpack.c.l.bf16 %v895_v14  ;;  %v853_v20 = vpop.f32.mrb[7].mxu0 }
 0x1a1   :  { %977 = vst [vmem:[%s1341_s3 + $0xc] sm:$0xff] %v981_v17  ;;  %v912_v22 = vunpack.c.l.bf16 %v896_v16  ;;  %v927_v32 = vsel %vm739_vm15, %v925_v27, 0.0 }
 0x1a2   :  { %v914_v23 = vmul.f32 %v911_v19, %v723_v49 }
 0x1a3   :  { %v915_v24 = vmul.f32 %v912_v22, %v727_v54 }
 0x1a4   :  { %v923_v25 = vmul.f32 %v914_v23, %v911_v19 }
 0x1a5   :  { %v924_v28 = vmul.f32 %v915_v24, %v912_v22  ;;  %v917_v29 = vadd.f32 %v915_v24, %v914_v23 }
 0x1a7   :  { %v919_v30 = vadd.f32 %v918_v26, %v917_v29  ;;  %v926_v31 = vadd.f32 %v924_v28, %v923_v25 }
 0x1a9   :  { %920 = vadd.xlane.f32.xlu0 %v919_v30  ;;  %v928_v33 = vadd.f32 %v927_v32, %v926_v31 }
 0x1ad   :  { %929 = vadd.xlane.f32.xlu0 %v928_v33 }
 0x216   :  { %v743_v34 = vpop.xlane.xlu0 %742 }
 0x218   :  { %v752_v40 = vpop.xlane.xlu1 %751 }
 0x236   :  { %v921_v35 = vpop.xlane.xlu0 %920 }
 0x237   :  { %v922_v36 = vadd.f32 %v921_v35, %v743_v34 }
 0x239   :  { %933 = vst.msk [vmem:[%s1342_s4] sm:$0xff] %vm932_vm0, %v922_v36 }
 0x23a   :  { %v930_v37 = vpop.xlane.xlu0 %929 }
 0x23b   :  { %v931_v38 = vadd.f32 %v930_v37, %v752_v40 }
 0x23d   :  { %934 = vst.msk [vmem:[%s1343_s5] sm:$0xff] %vm932_vm0, %v931_v38 }

</bundles_post_ra>
